<compile_context>
chip_gen: v6e
topology: v6e:2x2x1
jax: 0.10.0
libtpu: 0.0.40
codegen_flags: <defaults>
</compile_context>

<pallas_src>
import functools

import jax
import jax.numpy as jnp
from jax.experimental import pallas as pl
from jax.experimental.pallas import tpu as pltpu

LANE_W = 512                 # lane-dense width (multiple of 128)
MAX_TILE_R = 512             # up to 512x512 f32 = 1 MiB per input block
NUM_SPLITS = 2               # v7x has 2 TensorCores; harmless on v5e/v6e
SMALL_PATH_MAX_ROWS = 4096   # below this, run the single-block exact kernel


def _cdiv(a, b):
    return -(-a // b)


def _round_up(a, b):
    return _cdiv(a, b) * b


# ----------------------------------------------------------------------------
# Small path: whole problem in one VMEM block, exact row-structured math.
# ----------------------------------------------------------------------------
def _loss_kp_small_kernel(p_ref, t_ref, c_ref, num_ref, den_ref):
    p = p_ref[...].astype(jnp.float32)          # (N, D)
    t = t_ref[...].astype(jnp.float32)
    c = c_ref[...].astype(jnp.float32)          # (N, 1)
    d = p - t
    dist = jnp.sum(d * d, axis=-1, keepdims=True)
    num_ref[0, 0] = jnp.sum(dist * c)
    den_ref[0, 0] = jnp.sum(c)


def _loss_keypoints_small(pred2, target2, conf2):
    N, D = pred2.shape
    n_pad = _round_up(max(N, 8), 8)             # tiny sublane-alignment pad
    if n_pad != N:
        pred2 = jnp.pad(pred2, ((0, n_pad - N), (0, 0)))
        target2 = jnp.pad(target2, ((0, n_pad - N), (0, 0)))
        conf2 = jnp.pad(conf2, ((0, n_pad - N), (0, 0)))

    num, den = pl.pallas_call(
        _loss_kp_small_kernel,
        out_shape=(jax.ShapeDtypeStruct((1, 1), jnp.float32),
                   jax.ShapeDtypeStruct((1, 1), jnp.float32)),
        grid_spec=pltpu.PrefetchScalarGridSpec(
            num_scalar_prefetch=0,
            grid=(1,),
            in_specs=[
                pl.BlockSpec((n_pad, D), lambda i: (0, 0)),
                pl.BlockSpec((n_pad, D), lambda i: (0, 0)),
                pl.BlockSpec((n_pad, 1), lambda i: (0, 0)),
            ],
            out_specs=[
                pl.BlockSpec((1, 1), lambda i: (0, 0), memory_space=pltpu.SMEM),
                pl.BlockSpec((1, 1), lambda i: (0, 0), memory_space=pltpu.SMEM),
            ],
        ),
        compiler_params=pltpu.CompilerParams(dimension_semantics=("arbitrary",)),
    )(pred2, target2, conf2)
    return num[0, 0] / den[0, 0]


# ----------------------------------------------------------------------------
# Tiled lane-dense path: grid = (split, row_block); split axis is "parallel"
# (both v7x TensorCores), row_block axis is the "arbitrary" reduction.
# ----------------------------------------------------------------------------
def _loss_kp_tiled_kernel(p_ref, t_ref, c_ref, num_ref, den_ref,
                          acc_num, acc_den):
    j = pl.program_id(1)

    @pl.when(j == 0)
    def _init():
        acc_num[...] = jnp.zeros_like(acc_num)
        acc_den[...] = jnp.zeros_like(acc_den)

    p = p_ref[...].astype(jnp.float32)          # (tile_r, LANE_W)
    t = t_ref[...].astype(jnp.float32)
    c = c_ref[...].astype(jnp.float32)          # conf broadcast over coords
    d = p - t
    acc_num[...] += d * d * c                   # pure VPU elementwise adds
    acc_den[...] += c

    @pl.when(j == pl.num_programs(1) - 1)
    def _finalize():
        # single cross-lane/sublane reduction per split, only in the epilogue
        num_ref[0, 0] = jnp.sum(acc_num[...])
        den_ref[0, 0] = jnp.sum(acc_den[...])


def _loss_keypoints_tiled(pred2, target2, conf2, max_tile_r=MAX_TILE_R):
    N, D = pred2.shape
    E = N * D

    # Static tiling plan (shapes are static under trace). Pick the block count
    # first, then derive the tile height -> padding is bounded by ~8 rows +
    # one LANE_W remainder per split (instead of up to a whole max-size tile).
    r_needed = _cdiv(E, LANE_W)
    splits = NUM_SPLITS if r_needed >= NUM_SPLITS * 8 else 1
    rows_per_split = _cdiv(r_needed, splits)
    max_tile_r = max(8, _round_up(max_tile_r, 8))
    blocks_per_split = _cdiv(rows_per_split, max_tile_r)
    tile_r = _round_up(_cdiv(rows_per_split, blocks_per_split), 8)
    r_total = splits * blocks_per_split * tile_r
    e_pad = r_total * LANE_W

    # Lane-dense flat views (contiguous reshapes are free). conf is broadcast
    # across the coord axis; inputs keep their native dtype (cast in-kernel).
    pf = pred2.reshape(-1)
    tf = target2.reshape(-1)
    cf = jnp.broadcast_to(conf2, (N, D)).reshape(-1)
    pad = e_pad - E
    if pad:
        # zero-padded tail: conf == 0 there, so it contributes 0 to num and den
        pf = jnp.pad(pf, (0, pad))
        tf = jnp.pad(tf, (0, pad))
        cf = jnp.pad(cf, (0, pad))
    pf = pf.reshape(r_total, LANE_W)
    tf = tf.reshape(r_total, LANE_W)
    cf = cf.reshape(r_total, LANE_W)

    def in_map(i, j):
        return (i * blocks_per_split + j, 0)

    num_p, den_p = pl.pallas_call(
        _loss_kp_tiled_kernel,
        out_shape=(jax.ShapeDtypeStruct((splits, 1), jnp.float32),
                   jax.ShapeDtypeStruct((splits, 1), jnp.float32)),
        grid_spec=pltpu.PrefetchScalarGridSpec(
            num_scalar_prefetch=0,
            grid=(splits, blocks_per_split),
            in_specs=[
                pl.BlockSpec((tile_r, LANE_W), in_map),
                pl.BlockSpec((tile_r, LANE_W), in_map),
                pl.BlockSpec((tile_r, LANE_W), in_map),
            ],
            out_specs=[
                pl.BlockSpec((1, 1), lambda i, j: (i, 0),
                             memory_space=pltpu.SMEM),
                pl.BlockSpec((1, 1), lambda i, j: (i, 0),
                             memory_space=pltpu.SMEM),
            ],
            scratch_shapes=[
                pltpu.VMEM((tile_r, LANE_W), jnp.float32),   # num accumulator
                pltpu.VMEM((tile_r, LANE_W), jnp.float32),   # den accumulator
            ],
        ),
        compiler_params=pltpu.CompilerParams(
            dimension_semantics=("parallel", "arbitrary")),
    )(pf, tf, cf)

    num = jnp.sum(num_p)
    den = jnp.sum(den_p) * (1.0 / D)   # conf was broadcast D times -> undo
    return num / den


@functools.partial(jax.jit, static_argnames=("max_tile_r",))
def loss_keypoints_pallas(pred, target, conf, *, max_tile_r=MAX_TILE_R):
    """Pallas equivalent of BaseKeypoints.loss_keypoints.

    pred/target: (..., J, D); conf: (..., J, 1) (or (..., J)).
    Returns a scalar float32 loss = sum(dist * conf) / sum(conf).
    """
    D = pred.shape[-1]
    pred2 = pred.reshape(-1, D)
    target2 = target.reshape(-1, D)
    if conf.ndim == pred.ndim - 1:
        conf = conf[..., None]
    conf2 = conf.reshape(-1, 1)

    N = pred2.shape[0]
    if N <= SMALL_PATH_MAX_ROWS and D <= 128:
        return _loss_keypoints_small(pred2, target2, conf2)
    return _loss_keypoints_tiled(pred2, target2, conf2, max_tile_r=max_tile_r)


class BaseKeypointsPallas:
    """JAX/Pallas port of BaseKeypoints (norm='l2', reduce='sum' path)."""

    def __init__(self, index_est=[], index_gt=[], ranges_est=[], ranges_gt=[]):
        self.index_est = index_est
        self.index_gt = index_gt
        self.ranges_est = ranges_est
        self.ranges_gt = ranges_gt

    @staticmethod
    def select(keypoints, index, ranges):
        # pure indexing glue — plain JAX
        if len(index) > 0:
            keypoints = keypoints[..., jnp.asarray(index), :]
        elif len(ranges) > 0:
            if ranges[1] == -1:
                keypoints = keypoints[..., ranges[0]:, :]
            else:
                keypoints = keypoints[..., ranges[0]:ranges[1], :]
        return keypoints

    def forward(self, pred, target):
        # BaseLoss.forward is `pass` in the reference -> returns None.
        return None

    def loss_keypoints(self, pred, target, conf):
        # NOTE: as in the reference, conf is NOT re-selected here; the caller
        # is expected to pass conf matching the selected keypoints.
        pred = self.select(pred, self.index_est, self.ranges_est)
        target = self.select(target, self.index_gt, self.ranges_gt)
        return loss_keypoints_pallas(pred, target, conf)


# TODO(synk): the 'l1' and 'gm' (GMoF) norm variants of BaseLoss.make_loss are
# not kernelized; only the l2/'sum' path used by loss_keypoints is implemented.


if __name__ == "__main__":
    def ref_loss(pred, target, conf):
        dist = jnp.sum((pred - target) ** 2, axis=-1, keepdims=True)
        return jnp.sum(dist * conf) / jnp.sum(conf)

    model = BaseKeypointsPallas()
    assert model.forward(None, None) is None   # forward is a no-op in the spec

    # 1) Small shapes from the module's typical use (single-block path).
    k1, k2, k3 = jax.random.split(jax.random.PRNGKey(0), 3)
    B, J, D = 2, 25, 3
    pred = jax.random.normal(k1, (B, J, D), dtype=jnp.float32)
    target = jax.random.normal(k2, (B, J, D), dtype=jnp.float32)
    conf = jax.random.uniform(k3, (B, J, 1), dtype=jnp.float32)
    loss = jax.block_until_ready(model.loss_keypoints(pred, target, conf))
    assert jnp.allclose(loss, ref_loss(pred, target, conf), rtol=1e-4, atol=1e-5), \
        (loss, ref_loss(pred, target, conf))

    # 2) Larger batch -> tiled lane-dense path (padding + 2-way core split).
    k4, k5, k6 = jax.random.split(jax.random.PRNGKey(1), 3)
    B2, J2 = 8, 827   # 6616 keypoint rows > small-path threshold
    pred_b = jax.random.normal(k4, (B2, J2, D), dtype=jnp.float32)
    target_b = jax.random.normal(k5, (B2, J2, D), dtype=jnp.float32)
    conf_b = jax.random.uniform(k6, (B2, J2, 1), dtype=jnp.float32)
    loss_b = jax.block_until_ready(model.loss_keypoints(pred_b, target_b, conf_b))
    assert jnp.allclose(loss_b, ref_loss(pred_b, target_b, conf_b),
                        rtol=1e-4, atol=1e-5), (loss_b, ref_loss(pred_b, target_b, conf_b))

    # 3) bf16 inputs (no wrapper upcast) + forced multi-block accumulation per
    #    split, exercising the init / accumulate / flush pipeline.
    pred_h = pred_b.astype(jnp.bfloat16)
    target_h = target_b.astype(jnp.bfloat16)
    conf_h = conf_b.astype(jnp.bfloat16)
    loss_h = jax.block_until_ready(
        loss_keypoints_pallas(pred_h, target_h, conf_h, max_tile_r=16))
    ref_h = ref_loss(pred_h.astype(jnp.float32), target_h.astype(jnp.float32),
                     conf_h.astype(jnp.float32))
    assert jnp.allclose(loss_h, ref_h, rtol=5e-2, atol=1e-3), (loss_h, ref_h)

    print("KERNEL_OK")
</pallas_src>

<mosaic_0001>
module attributes {stable_mosaic.version = 11 : i64} {
  func.func @_loss_kp_small_kernel(%arg0: i32, %arg1: memref<56x3xf32, #tpu.memory_space<vmem>>, %arg2: memref<56x3xf32, #tpu.memory_space<vmem>>, %arg3: memref<56x1xf32, #tpu.memory_space<vmem>>, %arg4: memref<1x1xf32, #tpu.memory_space<smem>>, %arg5: memref<1x1xf32, #tpu.memory_space<smem>>) attributes {dimension_semantics = [#tpu.dimension_semantics<arbitrary>], iteration_bounds = array<i64: 1>, scalar_prefetch = 0 : i64, scratch_operands = 0 : i64, tpu.core_type = #tpu.core_type<tc>, window_params = [{pipeline_mode = #tpu.pipeline_mode<synchronous>, transform_indices = @transform_0, window_bounds = array<i64: 56, 3>}, {pipeline_mode = #tpu.pipeline_mode<synchronous>, transform_indices = @transform_1, window_bounds = array<i64: 56, 3>}, {pipeline_mode = #tpu.pipeline_mode<synchronous>, transform_indices = @transform_2, window_bounds = array<i64: 56, 1>}, {transform_indices = @transform_3, window_bounds = array<i64: 1, 1>}, {transform_indices = @transform_4, window_bounds = array<i64: 1, 1>}]} {
    %c0 = arith.constant 0 : index
    %c0_0 = arith.constant 0 : index
    %0 = vector.load %arg1[%c0, %c0_0] : memref<56x3xf32, #tpu.memory_space<vmem>>, vector<56x3xf32>
    %c0_1 = arith.constant 0 : index
    %c0_2 = arith.constant 0 : index
    %1 = vector.load %arg2[%c0_1, %c0_2] : memref<56x3xf32, #tpu.memory_space<vmem>>, vector<56x3xf32>
    %c0_3 = arith.constant 0 : index
    %c0_4 = arith.constant 0 : index
    %2 = vector.load %arg3[%c0_3, %c0_4] : memref<56x1xf32, #tpu.memory_space<vmem>>, vector<56x1xf32>
    %3 = arith.subf %0, %1 : vector<56x3xf32>
    %4 = arith.mulf %3, %3 : vector<56x3xf32>
    %cst = arith.constant dense<0.000000e+00> : vector<56xf32>
    %5 = vector.multi_reduction <add>, %4, %cst [1] : vector<56x3xf32> to vector<56xf32>
    %6 = vector.shape_cast %5 : vector<56xf32> to vector<56x1xf32>
    %7 = arith.mulf %6, %2 : vector<56x1xf32>
    %8 = vector.shape_cast %7 : vector<56x1xf32> to vector<1x56x1xf32>
    %cst_5 = arith.constant dense<0.000000e+00> : vector<1xf32>
    %9 = vector.multi_reduction <add>, %8, %cst_5 [1, 2] : vector<1x56x1xf32> to vector<1xf32>
    %10 = vector.shape_cast %9 : vector<1xf32> to vector<1x1x1xf32>
    %11 = vector.extract %10[0, 0, 0] : f32 from vector<1x1x1xf32>
    %c0_6 = arith.constant 0 : index
    %c0_7 = arith.constant 0 : index
    %12 = memref.load %arg4[%c0_6, %c0_7] : memref<1x1xf32, #tpu.memory_space<smem>>
    memref.store %11, %arg4[%c0_6, %c0_7] : memref<1x1xf32, #tpu.memory_space<smem>>
    %13 = vector.shape_cast %2 : vector<56x1xf32> to vector<1x56x1xf32>
    %cst_8 = arith.constant dense<0.000000e+00> : vector<1xf32>
    %14 = vector.multi_reduction <add>, %13, %cst_8 [1, 2] : vector<1x56x1xf32> to vector<1xf32>
    %15 = vector.shape_cast %14 : vector<1xf32> to vector<1x1x1xf32>
    %16 = vector.extract %15[0, 0, 0] : f32 from vector<1x1x1xf32>
    %c0_9 = arith.constant 0 : index
    %c0_10 = arith.constant 0 : index
    %17 = memref.load %arg5[%c0_9, %c0_10] : memref<1x1xf32, #tpu.memory_space<smem>>
    memref.store %16, %arg5[%c0_9, %c0_10] : memref<1x1xf32, #tpu.memory_space<smem>>
    return
  }
  func.func @transform_0(%arg0: i32) -> (i32, i32) {
    %c0_i32 = arith.constant 0 : i32
    %c0_i32_0 = arith.constant 0 : i32
    %c0_i32_1 = arith.constant 0 : i32
    return %c0_i32, %c0_i32_0 : i32, i32
  }
  func.func @transform_1(%arg0: i32) -> (i32, i32) {
    %c0_i32 = arith.constant 0 : i32
    %c0_i32_0 = arith.constant 0 : i32
    %c0_i32_1 = arith.constant 0 : i32
    return %c0_i32, %c0_i32_0 : i32, i32
  }
  func.func @transform_2(%arg0: i32) -> (i32, i32) {
    %c0_i32 = arith.constant 0 : i32
    %c0_i32_0 = arith.constant 0 : i32
    %c0_i32_1 = arith.constant 0 : i32
    return %c0_i32, %c0_i32_0 : i32, i32
  }
  func.func @transform_3(%arg0: i32) -> (i32, i32) {
    %c0_i32 = arith.constant 0 : i32
    %c0_i32_0 = arith.constant 0 : i32
    %c0_i32_1 = arith.constant 0 : i32
    return %c0_i32, %c0_i32_0 : i32, i32
  }
  func.func @transform_4(%arg0: i32) -> (i32, i32) {
    %c0_i32 = arith.constant 0 : i32
    %c0_i32_0 = arith.constant 0 : i32
    %c0_i32_1 = arith.constant 0 : i32
    return %c0_i32, %c0_i32_0 : i32, i32
  }
}

</mosaic_0001>

<bundles_post_ra>
// kernel: loss_keypoints_pallas.1
= control target key start
LH: loop header
LB: loop body
LE: loop exit
PB: predicated region body
PF: predicated region fallthrough
CT: control target
= control target key end

     0   :  { %10 = vsyncpa [#allocation3], 0  ;;  %vm53_vm0 = vcmask 23552   ;;  %s299_s0 = inlined_call_operand.vmem [shape: f32[56,3], index: 0, kind: input, shape index: {}]   ;;  %s300_s1 = inlined_call_operand.vmem [shape: f32[56,3], index: 1, kind: input, shape index: {}]   ;;  %s301_s2 = inlined_call_operand.vmem [shape: f32[56,1], index: 2, kind: input, shape index: {}]   ;;  %s302_s3 = inlined_call_operand.hbm [shape: f32[1,1], index: 3, kind: output, shape index: {0}]   ;;  %s303_s4 = inlined_call_operand.hbm [shape: f32[1,1], index: 4, kind: output, shape index: {1}]  }
   0x1   :  { %v18_v0 = vld [vmem:[%s299_s0] sm:$0xff]  ;;  %v20_v2 = vld [vmem:[%s299_s0 + $0x10] sm:$0xff]  ;;  %v19_v5 = vld [vmem:[%s299_s0 + $0x8] sm:$0xff] }
   0x2   :  { %v25_v1 = vld [vmem:[%s300_s1] sm:$0xff]  ;;  %v27_v4 = vld [vmem:[%s300_s1 + $0x10] sm:$0xff]  ;;  %v26_v6 = vld [vmem:[%s300_s1 + $0x8] sm:$0xff] }
   0x3   :  { %v39_v3 = vsub.f32 %v18_v0, %v25_v1  ;;  %v41_v7 = vsub.f32 %v20_v2, %v27_v4  ;;  %v40_v8 = vsub.f32 %v19_v5, %v26_v6  ;;  %v21_v9 = vld [vmem:[%s299_s0 + $0x18] sm:$0xff]  ;;  %v22_v11 = vld [vmem:[%s299_s0 + $0x20] sm:$0xff]  ;;  %v23_v15 = vld [vmem:[%s299_s0 + $0x28] sm:$0xff] }
   0x4   :  { %v28_v10 = vld [vmem:[%s300_s1 + $0x18] sm:$0xff]  ;;  %v29_v14 = vld [vmem:[%s300_s1 + $0x20] sm:$0xff]  ;;  %v30_v16 = vld [vmem:[%s300_s1 + $0x28] sm:$0xff] }
   0x5   :  { %v46_v12 = vmul.f32 %v39_v3, %v39_v3  ;;  %v42_v13 = vsub.f32 %v21_v9, %v28_v10  ;;  %v48_v17 = vmul.f32 %v41_v7, %v41_v7  ;;  %v47_v18 = vmul.f32 %v40_v8, %v40_v8  ;;  %v24_v21 = vld [vmem:[%s299_s0 + $0x30] sm:$0xff] }
   0x6   :  { %v43_v19 = vsub.f32 %v22_v11, %v29_v14  ;;  %v44_v20 = vsub.f32 %v23_v15, %v30_v16  ;;  %v31_v22 = vld [vmem:[%s300_s1 + $0x30] sm:$0xff] }
   0x7   :  { %v54_v23 = vsel %vm53_vm0, %v46_v12, 0.0  ;;  %v49_v24 = vmul.f32 %v42_v13, %v42_v13 }
   0x8   :  { %11 = vsyncpa [#allocation5], 0  ;;  %55 = vadd.xlane.f32.xlu0 %v54_v23  ;;  %v60_v25 = vsel %vm53_vm0, %v48_v17, 0.0  ;;  %v57_v26 = vsel %vm53_vm0, %v47_v18, 0.0  ;;  %v50_v27 = vmul.f32 %v43_v19, %v43_v19  ;;  %v45_v28 = vsub.f32 %v24_v21, %v31_v22  ;;  %v32_v33 = vld [vmem:[%s301_s2] sm:$0xff]  ;;  %v33_v37 = vld [vmem:[%s301_s2 + $0x8] sm:$0xff] }
   0x9   :  { %61 = vadd.xlane.f32.xlu1 %v60_v25  ;;  %v63_v29 = vsel %vm53_vm0, %v49_v24, 0.0  ;;  %v51_v30 = vmul.f32 %v44_v20, %v44_v20  ;;  %vm82_vm1 = vcmask 7168   ;;  %v34_v39 = vld [vmem:[%s301_s2 + $0x10] sm:$0xff]  ;;  %v35_v42 = vld [vmem:[%s301_s2 + $0x18] sm:$0xff]  ;;  %v36_v46 = vld [vmem:[%s301_s2 + $0x20] sm:$0xff]  ;;  %s182_s30 = smov [#allocation2]  }
   0xa   :  { %v66_v31 = vsel %vm53_vm0, %v50_v27, 0.0  ;;  %v52_v32 = vmul.f32 %v45_v28, %v45_v28  ;;  %v107_v35 = vsel %vm82_vm1, %v32_v33, 0.0  ;;  %v108_v38 = vsel %vm82_vm1, %v33_v37, 0.0  ;;  %v37_v49 = vld [vmem:[%s301_s2 + $0x28] sm:$0xff]  ;;  %v38_v51 = vld [vmem:[%s301_s2 + $0x30] sm:$0xff]  ;;  %s183_s7 = smov [#allocation4]  }
   0xb   :  { %v69_v34 = vsel %vm53_vm0, %v51_v30, 0.0  ;;  %v109_v40 = vadd.f32 %v108_v38, %v107_v35  ;;  %v110_v41 = vsel %vm82_vm1, %v34_v39, 0.0  ;;  %v112_v44 = vsel %vm82_vm1, %v35_v42, 0.0 }
   0xc   :  { %58 = vadd.xlane.f32.xlu0 %v57_v26  ;;  %v72_v36 = vsel %vm53_vm0, %v52_v32, 0.0  ;;  %v114_v47 = vsel %vm82_vm1, %v36_v46, 0.0  ;;  %v116_v50 = vsel %vm82_vm1, %v37_v49, 0.0  ;;  %v118_v53 = vsel %vm82_vm1, %v38_v51, 0.0 }
   0xd   :  { %64 = vadd.xlane.f32.xlu1 %v63_v29  ;;  %v111_v43 = vadd.f32 %v110_v41, %v109_v40 }
   0xf   :  { %v113_v45 = vadd.f32 %v112_v44, %v111_v43 }
  0x10   :  { %67 = vadd.xlane.f32.xlu0 %v66_v31 }
  0x11   :  { %70 = vadd.xlane.f32.xlu1 %v69_v34  ;;  %v115_v48 = vadd.f32 %v114_v47, %v113_v45 }
  0x13   :  { %v117_v52 = vadd.f32 %v116_v50, %v115_v48 }
  0x14   :  { %73 = vadd.xlane.f32.xlu0 %v72_v36 }
  0x15   :  { %v119_v54 = vadd.f32 %v118_v53, %v117_v52 }
  0x18   :  { %120 = vadd.xlane.f32.xlu0 %v119_v54 }
  0x91   :  { %v56_v55 = vpop.xlane.xlu0 %55 }
  0x92   :  { %v62_v56 = vpop.xlane.xlu1 %61  ;;  %v75_v57 = vmul.f32 %v56_v55, %v32_v33 }
  0x93   :  { %v77_v59 = vmul.f32 %v62_v56, %v34_v39 }
  0x94   :  { %v83_v63 = vsel %vm82_vm1, %v75_v57, 0.0 }
  0x95   :  { %v59_v58 = vpop.xlane.xlu0 %58  ;;  %v86_v3 = vsel %vm82_vm1, %v77_v59, 0.0 }
  0x96   :  { %v76_v60 = vmul.f32 %v59_v58, %v33_v37  ;;  %v65_v61 = vpop.xlane.xlu1 %64 }
  0x97   :  { %v78_v62 = vmul.f32 %v65_v61, %v35_v42 }
  0x98   :  { %v84_v0 = vsel %vm82_vm1, %v76_v60, 0.0 }
  0x99   :  { %v85_v1 = vadd.f32 %v84_v0, %v83_v63  ;;  %v68_v2 = vpop.xlane.xlu0 %67  ;;  %v88_v4 = vsel %vm82_vm1, %v78_v62, 0.0 }
  0x9a   :  { %v79_v5 = vmul.f32 %v68_v2, %v36_v46  ;;  %v71_v6 = vpop.xlane.xlu1 %70 }
  0x9b   :  { %v87_v7 = vadd.f32 %v86_v3, %v85_v1  ;;  %v80_v8 = vmul.f32 %v71_v6, %v37_v49 }
  0x9c   :  { %v90_v9 = vsel %vm82_vm1, %v79_v5, 0.0 }
  0x9d   :  { %v89_v10 = vadd.f32 %v88_v4, %v87_v7  ;;  %v74_v11 = vpop.xlane.xlu0 %73  ;;  %v92_v12 = vsel %vm82_vm1, %v80_v8, 0.0 }
  0x9e   :  { %v81_v13 = vmul.f32 %v74_v11, %v38_v51 }
  0x9f   :  { %v91_v14 = vadd.f32 %v90_v9, %v89_v10 }
  0xa0   :  { %v94_v15 = vsel %vm82_vm1, %v81_v13, 0.0 }
  0xa1   :  { %v93_v16 = vadd.f32 %v92_v12, %v91_v14  ;;  %v121_v18 = vpop.xlane.xlu0 %120 }
  0xa2   :  { %v122_v19 = vrot.slane %v121_v18, 4 }
  0xa3   :  { %v95_v17 = vadd.f32 %v94_v15, %v93_v16 }
  0xa4   :  { %v123_v20 = vadd.f32 %v122_v19, %v121_v18 }
  0xa5   :  { %96 = vadd.xlane.f32.xlu1 %v95_v17 }
  0xa6   :  { %v124_v21 = vrot.slane %v123_v20, 2 }
  0xa8   :  { %v125_v25 = vadd.f32 %v124_v21, %v123_v20 }
  0xaa   :  { %v126_v28 = vrot.slane %v125_v25, 1 }
  0xac   :  { %v127_v31 = vadd.f32 %v126_v28, %v125_v25 }
 0x12e   :  { %v97_v22 = vpop.xlane.xlu1 %96 }
 0x12f   :  { %v98_v23 = vrot.slane %v97_v22, 4 }
 0x131   :  { %v99_v24 = vadd.f32 %v98_v23, %v97_v22 }
 0x133   :  { %v100_v26 = vrot.slane %v99_v24, 2 }
 0x135   :  { %v101_v27 = vadd.f32 %v100_v26, %v99_v24 }
 0x137   :  { %v102_v29 = vrot.slane %v101_v27, 1 }
 0x139   :  { %v103_v30 = vadd.f32 %v102_v29, %v101_v27 }
 0x13b   :  { %156 = vpush %v103_v30 }
 0x13c   :  { %158 = vpush %v127_v31 }
 0x16c   :  { %s157_s2 = spop %156 }
 0x16d   :  { %s159_s29 = spop %158  ;;  %106 = sst [smem:[#allocation2]] %s157_s2 }
 0x16e   :  { %130 = sst [smem:[#allocation4]] %s159_s29 }
 0x16f   :  { %138 = dma.smem_to_hbm %s182_s30, 16, %s302_s3, [#allocation3]  }
 0x170   :  { %146 = dma.smem_to_hbm %s183_s7, 16, %s303_s4, [#allocation5]  }
 0x171   :  { %178 = dma.done.wait [#allocation3], 16  }
 0x172   :  { %179 = vsyncadd [#allocation3], 4294967280 }
 0x173   :  { %180 = dma.done.wait [#allocation5], 16  }
 0x174   :  { %181 = vsyncadd [#allocation5], 4294967280 }
 0x175   :  { %153 = sfence }
 0x176   :  { %154 = vsyncpa [#allocation3], 1 }
 0x177   :  { %155 = vsyncpa [#allocation5], 1 }

</bundles_post_ra>
